<compile_context>
chip_gen: v6e
topology: v6e:2x2x1
jax: 0.10.0
libtpu: 0.0.40
codegen_flags: <defaults>
</compile_context>

<pallas_src>
import functools
import math

import jax
import jax.numpy as jnp
from jax.experimental import pallas as pl
from jax.experimental.pallas import tpu as pltpu

_LANES = 128


def _round_up(a, b):
    return -(-a // b) * b


def _vmem_limit_bytes():
    # Re-derive the scoped-VMEM budget from hardware (v7x has only 64 MiB of
    # physical VMEM per TensorCore vs 128 MiB on v5e/v6e); keep headroom for
    # double-buffering.
    cap = 64 * 1024 * 1024
    try:
        info = pltpu.get_tpu_info()
        cap = int(getattr(info, "vmem_capacity_bytes", cap)) or cap
    except Exception:
        pass
    return int(min(max(cap // 2, 32 * 1024 * 1024), 64 * 1024 * 1024))


_VMEM_LIMIT = _vmem_limit_bytes()


# ----------------------------------------------------------------------------
# Residual add (the only live op of BasicBlock.forward): out = x + x
# ----------------------------------------------------------------------------
def _self_add_kernel(x_ref, o_ref):
    o_ref[...] = x_ref[...] + x_ref[...]


def residual_self_add(x, *, target_block_bytes=2 * 1024 * 1024):
    """out = x + x, viewed lane-dense as (rows, L) where L is the widest of
    {1024, 512, 256, 128} lanes dividing x.size (a contiguous reshape -- no
    data movement), tiled over rows with ~2 MiB blocks (near the HBM roofline
    vs ~63% at 256 KiB blocks).  A ragged last row-block is handled by Pallas
    boundary masking (grid = cdiv), so no wrapper-side pad/crop HBM copies are
    introduced and input_output_aliases keeps the op in place when x is
    donated."""
    orig_shape = x.shape
    n = x.size
    itemsize = jnp.dtype(x.dtype).itemsize

    lanes = None
    for cand in (1024, 512, 256, 128):
        if n % cand == 0:
            lanes = cand
            break
    if lanes is None:
        # TODO(synk): sizes not divisible by 128 fall back to a padded copy; a
        # masked in-kernel tail would avoid the extra pad/crop HBM traffic.
        pad = _round_up(n, _LANES) - n
        flat = jnp.pad(x.reshape(-1), (0, pad))
        return residual_self_add(flat)[:n].reshape(orig_shape)

    rows = n // lanes
    target_rows = max(8, target_block_bytes // (lanes * itemsize))
    if rows >= 8:
        tm = max(8, (min(rows, target_rows) // 8) * 8)
    else:
        tm = rows                       # full-dim block (allowed for any size)
    grid = (pl.cdiv(rows, tm),)

    x2 = x.reshape(rows, lanes)
    out2 = pl.pallas_call(
        _self_add_kernel,
        out_shape=jax.ShapeDtypeStruct((rows, lanes), x.dtype),
        grid_spec=pltpu.PrefetchScalarGridSpec(
            num_scalar_prefetch=0,
            grid=grid,
            in_specs=[pl.BlockSpec((tm, lanes), lambda i: (i, 0))],
            out_specs=pl.BlockSpec((tm, lanes), lambda i: (i, 0))),
        compiler_params=pltpu.CompilerParams(
            dimension_semantics=("parallel",),
            vmem_limit_bytes=_VMEM_LIMIT),
        input_output_aliases={0: 0},
    )(x2)
    return out2.reshape(orig_shape)


# ----------------------------------------------------------------------------
# 3x3 VALID conv (+bias) with fused BatchNorm pass-1 statistics
# Layout: spatial in lanes, channels in sublanes (NCHW native).
# ----------------------------------------------------------------------------
def _conv3x3_kernel(x_ref, w_ref, b_ref, mask_ref, y_ref, stats_ref, slab_ref,
                    *, row_stride, lanes_in, lanes_out, cin):
    # x_ref    : (1, Cin, lanes_in)   image, channels in sublanes, row-major
    #                                 spatial index h*Win + w in lanes
    # w_ref    : (Cout, 9*Cin)        tap-major weights, column = k*Cin + ci
    # b_ref    : (Cout, 1)
    # mask_ref : (1, lanes_out)       1.0 on kept output pixels, 0.0 elsewhere
    # y_ref    : (1, Cout, lanes_out) lane-dense conv output (+bias)
    # stats_ref: (1, Cout, 2)         per-image [sum, sum_sq] over kept pixels
    # slab_ref : (9*Cin, lanes_out)   f32 scratch: folded K = 9*Cin operand
    x = x_ref[0].astype(jnp.float32)                       # (Cin, lanes_in)
    for k in range(9):
        kh, kw = divmod(k, 3)
        s = kh * row_stride + kw
        if s == 0:
            shifted = x
        else:
            # lane roll-left by s (XLU rotate): shifted[:, p] = x[:, p + s]
            shifted = pltpu.roll(x, shift=lanes_in - s, axis=1)
        slab_ref[k * cin:(k + 1) * cin, :] = shifted[:, :lanes_out]

    # Single K = 9*Cin matmul -> lane-dense (Cout, lanes_out) result -> one
    # unmasked store (no per-tap accumulator round trips, no 4/128 lane mask).
    acc = jnp.dot(w_ref[...], slab_ref[...],
                  preferred_element_type=jnp.float32)
    acc = acc + b_ref[...]
    y_ref[0] = acc.astype(y_ref.dtype)

    # Fused BatchNorm pass-1 statistics (mask drops the over-computed columns
    # w >= Wout and the lane padding), so BN never re-reads the activations.
    masked = acc * mask_ref[...]
    stats_ref[0, :, 0:1] = jnp.sum(masked, axis=1, keepdims=True)
    stats_ref[0, :, 1:2] = jnp.sum(masked * acc, axis=1, keepdims=True)


def conv3x3_valid_flat_nchw(x_nchw, w, b):
    """3x3 conv, stride 1, padding 0, NCHW in.

    Each image is flattened row-major to (Cin, Hin*Win) with the SPATIAL axis
    in lanes, so tap (kh, kw) is a static lane shift of kh*Win + kw; the nine
    shifted copies are staged once into a (9*Cin, lanes_out) VMEM slab and
    contracted with the (Cout, 9*Cin) weights in one MXU matmul.  Output
    columns w >= Wout of each row are over-computed and masked/cropped later
    (ratio Win/Wout, negligible) -- this keeps all stores lane-dense and
    avoids any im2col materialization in HBM.

    Returns (y_flat, stats):
      y_flat: (N, Cout, lanes_out), lanes_out = round_up(Ho*Win, 128); kept
              output pixel (h, w) lives at lane h*Win + w.
      stats : (N, Cout, 2) per-image [sum, sum_sq] over kept pixels
              (BatchNorm pass 1, fused into the conv epilogue).
    """
    N, Cin, Hin, Win = x_nchw.shape
    Cout = w.shape[0]
    Ho, Wo = Hin - 2, Win - 2
    lout = Ho * Win
    lanes_out = _round_up(lout, _LANES)
    # Room for the largest tap shift (2*Win + 2) beyond lanes_out; always
    # covers the full image, so no roll wrap-around reaches a kept pixel.
    lanes_in = lanes_out + _round_up(2 * Win + 2, _LANES)

    xf = x_nchw.reshape(N, Cin, Hin * Win)
    xf = jnp.pad(xf, ((0, 0), (0, 0), (0, lanes_in - Hin * Win)))

    # tap-major weights: column index k*Cin + ci with k = kh*3 + kw
    wk = jnp.transpose(w, (0, 2, 3, 1)).reshape(Cout, 9 * Cin).astype(jnp.float32)
    bk = b.reshape(Cout, 1).astype(jnp.float32)

    # kept-pixel lane mask (tiny, computed once in XLA glue)
    lane = jnp.arange(lanes_out)
    mask = ((lane < lout) & (lane % Win < Wo)).astype(jnp.float32).reshape(1, lanes_out)

    kernel = functools.partial(_conv3x3_kernel, row_stride=Win,
                               lanes_in=lanes_in, lanes_out=lanes_out, cin=Cin)
    y_flat, stats = pl.pallas_call(
        kernel,
        out_shape=(jax.ShapeDtypeStruct((N, Cout, lanes_out), x_nchw.dtype),
                   jax.ShapeDtypeStruct((N, Cout, 2), jnp.float32)),
        grid_spec=pltpu.PrefetchScalarGridSpec(
            num_scalar_prefetch=0,
            grid=(N,),            # per-image; "parallel" so both v7x TCs work
            in_specs=[pl.BlockSpec((1, Cin, lanes_in), lambda n: (n, 0, 0)),
                      pl.BlockSpec((Cout, 9 * Cin), lambda n: (0, 0)),
                      pl.BlockSpec((Cout, 1), lambda n: (0, 0)),
                      pl.BlockSpec((1, lanes_out), lambda n: (0, 0))],
            out_specs=(pl.BlockSpec((1, Cout, lanes_out), lambda n: (n, 0, 0)),
                       pl.BlockSpec((1, Cout, 2), lambda n: (n, 0, 0))),
            scratch_shapes=[pltpu.VMEM((9 * Cin, lanes_out), jnp.float32)]),
        compiler_params=pltpu.CompilerParams(
            dimension_semantics=("parallel",),
            vmem_limit_bytes=_VMEM_LIMIT),
    )(xf, wk, bk, mask)
    # TODO(synk): for large H*W the whole-image block outgrows VMEM (notably
    # v7x's 64 MiB); switch to haloed row-block tiling with a second grid axis.
    return y_flat, stats


# ----------------------------------------------------------------------------
# BatchNorm2d (training-mode batch stats) apply + optional LeakyReLU(0.2)
# ----------------------------------------------------------------------------
def _bn_apply_kernel(y_ref, scale_ref, shift_ref, o_ref, *, slope, apply_act):
    y = y_ref[0].astype(jnp.float32)                  # (Cout, lanes_out)
    out = y * scale_ref[...] + shift_ref[...]         # per-channel affine
    if apply_act:
        out = jnp.where(out >= 0.0, out, slope * out)  # LeakyReLU(0.2)
    o_ref[0] = out.astype(o_ref.dtype)


def batchnorm_from_stats(y_flat, stats, gamma, beta, *, count, apply_act,
                         eps=1e-5, slope=0.2):
    """Training-mode BatchNorm (+ optional LeakyReLU) on the conv's flat
    lane-dense output.  Pass-1 statistics came fused from the conv epilogue,
    so the activations are read from HBM exactly once here (lane-dense loads
    and stores).  The tiny per-channel reduce / scale-shift precompute is XLA
    glue.  Note: var = E[x^2] - mean^2 in f32 (cancellation-prone only for
    large-mean activations; fine at these scales)."""
    N, Cout, lanes_out = y_flat.shape
    tot = jnp.sum(stats, axis=0)                       # (Cout, 2)
    mean = tot[:, 0] / count
    var = tot[:, 1] / count - mean * mean              # biased (PyTorch training)
    inv = jax.lax.rsqrt(var + eps)
    scale = (gamma * inv).reshape(Cout, 1).astype(jnp.float32)
    shift = (beta - mean * gamma * inv).reshape(Cout, 1).astype(jnp.float32)

    out = pl.pallas_call(
        functools.partial(_bn_apply_kernel, slope=slope, apply_act=apply_act),
        out_shape=jax.ShapeDtypeStruct((N, Cout, lanes_out), y_flat.dtype),
        grid_spec=pltpu.PrefetchScalarGridSpec(
            num_scalar_prefetch=0,
            grid=(N,),
            in_specs=[pl.BlockSpec((1, Cout, lanes_out), lambda n: (n, 0, 0)),
                      pl.BlockSpec((Cout, 1), lambda n: (0, 0)),
                      pl.BlockSpec((Cout, 1), lambda n: (0, 0))],
            out_specs=pl.BlockSpec((1, Cout, lanes_out), lambda n: (n, 0, 0))),
        compiler_params=pltpu.CompilerParams(
            dimension_semantics=("parallel",),
            vmem_limit_bytes=_VMEM_LIMIT),
    )(y_flat, scale, shift)
    # TODO(synk): BatchNorm running_mean/running_var buffer updates (training
    # side effects) are not modeled; only the forward output is reproduced.
    return out


def crop_flat_to_nchw(y_flat, hin, win):
    """One final crop of the over-computed columns: flat (N, Cout, lanes_out)
    -> NCHW (N, Cout, Ho, Wo).  hin/win are the CONV INPUT spatial dims."""
    N, Cout, _ = y_flat.shape
    ho, wo = hin - 2, win - 2
    lout = ho * win
    return y_flat[:, :, :lout].reshape(N, Cout, ho, win)[:, :, :, :wo]


def conv3x3_bn_nchw(x_nchw, w, b, gamma, beta, *, apply_act):
    """conv3x3 (VALID) -> BatchNorm (batch stats) [-> LeakyReLU(0.2)], NCHW."""
    N, _, Hin, Win = x_nchw.shape
    Ho, Wo = Hin - 2, Win - 2
    y_flat, stats = conv3x3_valid_flat_nchw(x_nchw, w, b)
    out_flat = batchnorm_from_stats(y_flat, stats, gamma, beta,
                                    count=N * Ho * Wo, apply_act=apply_act)
    return crop_flat_to_nchw(out_flat, Hin, Win)


# ----------------------------------------------------------------------------
# Module params + forward
# ----------------------------------------------------------------------------
def init_basic_block_params(key, inplanes, planes):
    k1, k2, k3, k4 = jax.random.split(key, 4)
    bound = 1.0 / math.sqrt(inplanes * 9)     # PyTorch Conv2d default init scale
    return dict(
        w1=jax.random.uniform(k1, (planes, inplanes, 3, 3), jnp.float32, -bound, bound),
        b1=jax.random.uniform(k2, (planes,), jnp.float32, -bound, bound),
        g1=jnp.ones((planes,), jnp.float32),
        beta1=jnp.zeros((planes,), jnp.float32),
        w2=jax.random.uniform(k3, (planes, inplanes, 3, 3), jnp.float32, -bound, bound),
        b2=jax.random.uniform(k4, (planes,), jnp.float32, -bound, bound),
        g2=jnp.ones((planes,), jnp.float32),
        beta2=jnp.zeros((planes,), jnp.float32),
    )


def basic_block_forward(x, params, *, run_dead_branches=False):
    """BasicBlock.forward: the reference overwrites `out` at every stage, so
    the returned value is x + residual (== 2*x).  Only that residual add is
    live; the conv/BN branches are excluded from the hot path (and stay
    DCE-able under jit even when run_dead_branches=True, since they are not
    marked side-effecting)."""
    if run_dead_branches:
        _ = conv3x3_bn_nchw(x, params["w1"], params["b1"],
                            params["g1"], params["beta1"], apply_act=True)
        xr = jnp.pad(x, ((0, 0), (0, 0), (1, 1), (1, 1)), mode="reflect")
        _ = conv3x3_bn_nchw(xr, params["w2"], params["b2"],
                            params["g2"], params["beta2"], apply_act=False)
    return residual_self_add(x)                 # the only live op


# ----------------------------------------------------------------------------
# Pure-JAX references (verification only)
# ----------------------------------------------------------------------------
def _ref_conv3x3_nchw(x_nchw, w, b):
    out = jax.lax.conv_general_dilated(
        x_nchw, w, window_strides=(1, 1), padding="VALID",
        dimension_numbers=("NCHW", "OIHW", "NCHW"),
        precision=jax.lax.Precision.HIGHEST)
    return out + b.reshape(1, -1, 1, 1)


def _ref_bn_lrelu_nchw(y, gamma, beta, *, apply_act, eps=1e-5, slope=0.2):
    mean = jnp.mean(y, axis=(0, 2, 3), keepdims=True)
    var = jnp.mean(jnp.square(y - mean), axis=(0, 2, 3), keepdims=True)
    out = ((y - mean) * jax.lax.rsqrt(var + eps) * gamma.reshape(1, -1, 1, 1)
           + beta.reshape(1, -1, 1, 1))
    if apply_act:
        out = jnp.where(out >= 0, out, slope * out)
    return out


if __name__ == "__main__":
    key = jax.random.PRNGKey(0)
    kx, kp = jax.random.split(key)
    N, C, H, W = 2, 4, 16, 16
    x = jax.random.normal(kx, (N, C, H, W), jnp.float32)
    params = init_basic_block_params(kp, inplanes=C, planes=C)

    # 1) Module forward (hot path: only the live residual add runs).
    out = jax.jit(basic_block_forward)(x, params)
    out = jax.block_until_ready(out)
    assert out.shape == (N, C, H, W)
    assert jnp.allclose(out, x + x, atol=1e-6), "forward mismatch vs reference"

    # 2) Standalone verification of the (dead-in-forward) conv/BN kernels.
    # conv1(x) (no pad) -> bn1 -> LeakyReLU(0.2)
    a1 = jax.jit(functools.partial(conv3x3_bn_nchw, apply_act=True))(
        x, params["w1"], params["b1"], params["g1"], params["beta1"])
    a1 = jax.block_until_ready(a1)
    a1_ref = _ref_bn_lrelu_nchw(_ref_conv3x3_nchw(x, params["w1"], params["b1"]),
                                params["g1"], params["beta1"], apply_act=True)
    assert a1.shape == (N, C, H - 2, W - 2)
    assert jnp.allclose(a1, a1_ref, atol=2e-2, rtol=0.0), "conv1/bn1 mismatch"

    # reflection2(x) -> conv2 -> bn2
    xr = jnp.pad(x, ((0, 0), (0, 0), (1, 1), (1, 1)), mode="reflect")
    a2 = jax.jit(functools.partial(conv3x3_bn_nchw, apply_act=False))(
        xr, params["w2"], params["b2"], params["g2"], params["beta2"])
    a2 = jax.block_until_ready(a2)
    a2_ref = _ref_bn_lrelu_nchw(_ref_conv3x3_nchw(xr, params["w2"], params["b2"]),
                                params["g2"], params["beta2"], apply_act=False)
    assert a2.shape == (N, C, H, W)
    assert jnp.allclose(a2, a2_ref, atol=2e-2, rtol=0.0), "conv2/bn2 mismatch"

    print("KERNEL_OK")
</pallas_src>

<mosaic_0001>
module attributes {stable_mosaic.version = 11 : i64} {
  func.func @_self_add_kernel(%arg0: i32, %arg1: memref<2x1024xf32, #tpu.memory_space<vmem>>, %arg2: memref<2x1024xf32, #tpu.memory_space<vmem>>) attributes {dimension_semantics = [#tpu.dimension_semantics<parallel>], iteration_bounds = array<i64: 1>, scalar_prefetch = 0 : i64, scratch_operands = 0 : i64, tpu.core_type = #tpu.core_type<tc>, window_params = [{transform_indices = @transform_0, window_bounds = array<i64: 2, 1024>}, {transform_indices = @transform_1, window_bounds = array<i64: 2, 1024>}]} {
    %c0 = arith.constant 0 : index
    %c0_0 = arith.constant 0 : index
    %0 = vector.load %arg1[%c0, %c0_0] : memref<2x1024xf32, #tpu.memory_space<vmem>>, vector<2x1024xf32>
    %c0_1 = arith.constant 0 : index
    %c0_2 = arith.constant 0 : index
    %1 = vector.load %arg1[%c0_1, %c0_2] : memref<2x1024xf32, #tpu.memory_space<vmem>>, vector<2x1024xf32>
    %2 = arith.addf %0, %1 : vector<2x1024xf32>
    %c0_3 = arith.constant 0 : index
    %c0_4 = arith.constant 0 : index
    %3 = vector.load %arg2[%c0_3, %c0_4] : memref<2x1024xf32, #tpu.memory_space<vmem>>, vector<2x1024xf32>
    tpu.vector_store %arg2[%c0_3, %c0_4], %2 {strides = array<i32>} : memref<2x1024xf32, #tpu.memory_space<vmem>>, vector<2x1024xf32>,
    return
  }
  func.func @transform_0(%arg0: i32) -> (i32, i32) {
    %c0_i32 = arith.constant 0 : i32
    %c0_i32_0 = arith.constant 0 : i32
    return %arg0, %c0_i32 : i32, i32
  }
  func.func @transform_1(%arg0: i32) -> (i32, i32) {
    %c0_i32 = arith.constant 0 : i32
    %c0_i32_0 = arith.constant 0 : i32
    return %arg0, %c0_i32 : i32, i32
  }
}

</mosaic_0001>

<bundles_post_ra>
// kernel: basic_block_forward.1
= control target key start
LH: loop header
LB: loop body
LE: loop exit
PB: predicated region body
PF: predicated region fallthrough
CT: control target
= control target key end

     0   :  { %s40_s0 = inlined_call_operand.vmem [shape: f32[2,1024], index: 0, kind: input, shape index: {}, may-alias: {0,1}]   ;;  %s41_s1 = inlined_call_operand.vmem [shape: f32[2,1024], index: 1, kind: output, shape index: {}, may-alias: {0,1}]  }
   0x1   :  { %v8_v0 = vld [vmem:[%s40_s0] sm:$0xff]  ;;  %v9_v1 = vld [vmem:[%s40_s0 + $0x8] sm:$0xff] }
   0x2   :  { %v10_v2 = vadd.f32 %v8_v0, %v8_v0  ;;  %v11_v3 = vadd.f32 %v9_v1, %v9_v1 }
   0x4   :  { %12 = vst [vmem:[%s41_s1] sm:$0xff] %v10_v2  ;;  %13 = vst [vmem:[%s41_s1 + $0x8] sm:$0xff] %v11_v3 }

</bundles_post_ra>
